<compile_context>
chip_gen: v5e
topology: v5e:2x2
jax: 0.10.0
libtpu: 0.0.40
codegen_flags: <defaults>
</compile_context>

<pallas_src>
import functools

import jax
import jax.numpy as jnp
from jax.experimental import pallas as pl
from jax.experimental.pallas import tpu as pltpu

LN_EPS = 1e-5  # PyTorch nn.LayerNorm default


def _round_up(x, m):
    return ((x + m - 1) // m) * m


def _masked_ln_relu(z, mask, passthru, inv_n, gamma, beta):
    """ReLU everywhere; LayerNorm (biased variance over the masked block of width
    1/inv_n) then ReLU inside the masked columns.

    mask/passthru/gamma/beta are (1, N) rows; gamma/beta are zero outside the block
    and passthru = 1 - mask, so `ln + passthru * z` selects LN inside the block and
    the raw value outside without a compare/select pass.  One-pass statistics
    (E[x^2] - mean^2) save the diff materialization and second reduction input.
    """
    zm = z * mask
    mean = jnp.sum(zm, axis=-1, keepdims=True) * inv_n
    var = jnp.maximum(
        jnp.sum(zm * zm, axis=-1, keepdims=True) * inv_n - mean * mean, 0.0)
    ln = (z - mean) * (jax.lax.rsqrt(var + LN_EPS) * gamma) + beta
    return jnp.maximum(ln + passthru * z, 0.0)


def actor_kernel(xcat_ref, w1_ref, w2_ref, wh_ref, pk_ref, out_ref,
                 *, F1, F2, NP, N1, N2):
    pk = pk_ref[...]
    x = xcat_ref[...]

    # fused layer 1: [fc1 | cs | ratio_dis]   (fp32 accumulation on the MXU)
    z1 = jnp.dot(x.astype(w1_ref.dtype), w1_ref[...],
                 preferred_element_type=jnp.float32) + pk[0:1, :N1]
    z1 = _masked_ln_relu(z1, pk[7:8, :N1], pk[9:10, :N1], 1.0 / F1,
                         pk[2:3, :N1], pk[3:4, :N1])

    # fused layer 2: [fc2 | cs2 | ratio_dis2]
    z2 = jnp.dot(z1.astype(w2_ref.dtype), w2_ref[...],
                 preferred_element_type=jnp.float32) + pk[1:2, :N2]
    z2 = _masked_ln_relu(z2, pk[8:9, :N2], pk[10:11, :N2], 1.0 / F2,
                         pk[4:5, :N2], pk[5:6, :N2])

    # fused head: tanh((h2 + c2) @ Wmu + bmu - y), all in one matmul
    pre = jnp.dot(z2.astype(wh_ref.dtype), wh_ref[...],
                  preferred_element_type=jnp.float32) + pk[6:7, :NP]
    out_ref[...] = jnp.tanh(pre).astype(out_ref.dtype)


def make_params(key, input_dims, fc1_dims, fc2_dims, n_actions):
    """Parameter init mirroring the PyTorch module's shapes.

    Linear(in,out): weight stored transposed as (in, out); default PyTorch
    uniform(-1/sqrt(in), 1/sqrt(in)); the cs/cs2 layers use the module's custom
    uniform(-1/sqrt(out), 1/sqrt(out)). LayerNorm: weight=1, bias=0.
    """
    ks = jax.random.split(key, 16)

    def lin(kw, kb, fan_in, fan_out, bound):
        w = jax.random.uniform(kw, (fan_in, fan_out), jnp.float32, -bound, bound)
        b = jax.random.uniform(kb, (1, fan_out), jnp.float32, -bound, bound)
        return w, b

    p = {}
    p["w1"], p["b1"] = lin(ks[0], ks[1], input_dims, fc1_dims, 1.0 / jnp.sqrt(input_dims))
    p["w2"], p["b2"] = lin(ks[2], ks[3], fc1_dims, fc2_dims, 1.0 / jnp.sqrt(fc1_dims))
    p["wmu"], p["bmu"] = lin(ks[4], ks[5], fc2_dims, n_actions, 1.0 / jnp.sqrt(fc2_dims))
    # cs / cs2 use 1/sqrt(out_features) per the module's custom init
    p["wcs"], p["bcs"] = lin(ks[6], ks[7], 7, fc1_dims, 1.0 / jnp.sqrt(fc1_dims))
    p["wcs2"], p["bcs2"] = lin(ks[8], ks[9], fc1_dims, fc2_dims, 1.0 / jnp.sqrt(fc2_dims))
    p["g1"] = jnp.ones((1, fc1_dims), jnp.float32)
    p["be1"] = jnp.zeros((1, fc1_dims), jnp.float32)
    p["g2"] = jnp.ones((1, fc2_dims), jnp.float32)
    p["be2"] = jnp.zeros((1, fc2_dims), jnp.float32)
    p["wr1"], p["br1"] = lin(ks[10], ks[11], 1, 32, 1.0)           # 1/sqrt(1)
    p["wr2"], p["br2"] = lin(ks[12], ks[13], 32, n_actions, 1.0 / jnp.sqrt(32.0))
    return p


def fuse_params(p, input_dims, fc1_dims, fc2_dims, n_actions,
                weight_dtype=jnp.bfloat16):
    """Build the block-diagonal fused weights (in `weight_dtype`) and the packed
    bias/LN/mask/passthrough array (fp32) ONCE."""
    F1, F2, NA = fc1_dims, fc2_dims, n_actions
    NP = _round_up(NA, 128)                         # lane-dense output width
    Din = input_dims + 8 + 1                        # state | cs(7->8, zero col) | ratio
    N1 = _round_up(2 * F1 + 32, 128)                # [fc1 | cs | ratio_dis] (+zero pad)
    N2 = _round_up(2 * F2 + NA, 128)                # [fc2 | cs2 | y(n_actions)] (+pad)
    f32 = jnp.float32

    # layer-1 block-diagonal weight
    w1b = jnp.zeros((Din, N1), f32)
    w1b = w1b.at[:input_dims, :F1].set(p["w1"])
    w1b = w1b.at[input_dims:input_dims + 7, F1:2 * F1].set(p["wcs"])
    w1b = w1b.at[input_dims + 8, 2 * F1:2 * F1 + 32].set(p["wr1"][0])

    # layer-2 block-diagonal weight (y block only n_actions wide)
    w2b = jnp.zeros((N1, N2), f32)
    w2b = w2b.at[:F1, :F2].set(p["w2"])
    w2b = w2b.at[F1:2 * F1, F2:2 * F2].set(p["wcs2"])
    w2b = w2b.at[2 * F1:2 * F1 + 32, 2 * F2:2 * F2 + NA].set(p["wr2"])

    # head weight: (h2 + c2) @ wmu - y  as a single matmul
    wh = jnp.zeros((N2, NP), f32)
    wh = wh.at[:F2, :NA].set(p["wmu"])
    wh = wh.at[F2:2 * F2, :NA].set(p["wmu"])
    wh = wh.at[2 * F2:2 * F2 + NA, :NA].set(-jnp.eye(NA, dtype=f32))

    # packed biases / LayerNorm gamma,beta / LN masks / passthroughs -> one small array
    PC = max(N1, N2, NP)
    PR = 16
    mask1 = jnp.zeros((N1,), f32).at[F1:2 * F1].set(1.0)
    mask2 = jnp.zeros((N2,), f32).at[F2:2 * F2].set(1.0)
    pk = jnp.zeros((PR, PC), f32)
    pk = pk.at[0, :F1].set(p["b1"][0])
    pk = pk.at[0, F1:2 * F1].set(p["bcs"][0])
    pk = pk.at[0, 2 * F1:2 * F1 + 32].set(p["br1"][0])
    pk = pk.at[1, :F2].set(p["b2"][0])
    pk = pk.at[1, F2:2 * F2].set(p["bcs2"][0])
    pk = pk.at[1, 2 * F2:2 * F2 + NA].set(p["br2"][0])
    pk = pk.at[2, F1:2 * F1].set(p["g1"][0])
    pk = pk.at[3, F1:2 * F1].set(p["be1"][0])
    pk = pk.at[4, F2:2 * F2].set(p["g2"][0])
    pk = pk.at[5, F2:2 * F2].set(p["be2"][0])
    pk = pk.at[6, :NA].set(p["bmu"][0])
    pk = pk.at[7, :N1].set(mask1)                   # LN mask, layer 1 (cs block)
    pk = pk.at[8, :N2].set(mask2)                   # LN mask, layer 2 (cs2 block)
    pk = pk.at[9, :N1].set(1.0 - mask1)             # passthrough (non-LN cols), layer 1
    pk = pk.at[10, :N2].set(1.0 - mask2)            # passthrough (non-LN cols), layer 2

    return dict(w1b=w1b.astype(weight_dtype), w2b=w2b.astype(weight_dtype),
                wh=wh.astype(weight_dtype), pk=pk,
                F1=F1, F2=F2, NP=NP, Din=Din, N1=N1, N2=N2,
                n_actions=NA, input_dims=input_dims)


def actor_forward(state, cs, ratio, fp, *, block_b=1024, min_grid_steps=2,
                  out_dtype=jnp.float32):
    B = state.shape[0]
    F1, F2, NP = fp["F1"], fp["F2"], fp["NP"]
    N1, N2, Din = fp["N1"], fp["N2"], fp["Din"]
    n_actions = fp["n_actions"]

    # Batch tile: multiple of 8 sublanes.  Prefer >= min_grid_steps grid steps so the
    # "parallel" batch axis can shard across v7x's 2 TensorCores (neutral on v5e/v6e),
    # while keeping each tile large enough to amortize the ~0.35us/step overhead.
    B8 = _round_up(B, 8)
    TB = min(block_b, max(8, _round_up(pl.cdiv(B8, min_grid_steps), 8)))
    Bp = _round_up(B8, TB)

    cs_p = jnp.pad(cs, ((0, 0), (0, 1)))                         # 7 -> 8 features (zero col)
    xcat = jnp.concatenate([state, cs_p, ratio], axis=1).astype(jnp.float32)
    if Bp != B:
        xcat = jnp.pad(xcat, ((0, Bp - B), (0, 0)))

    PR, PC = fp["pk"].shape
    kernel = functools.partial(actor_kernel, F1=F1, F2=F2, NP=NP, N1=N1, N2=N2)

    w_item = jnp.dtype(fp["w1b"].dtype).itemsize
    out_item = jnp.dtype(out_dtype).itemsize
    w_bytes = w_item * (Din * N1 + N1 * N2 + N2 * NP)
    flops = 2 * Bp * (Din * N1 + N1 * N2 + N2 * NP)
    bytes_accessed = 4 * Bp * Din + w_bytes + 4 * PR * PC + out_item * Bp * NP
    transcendentals = Bp * (NP + 2)                              # tanh + 2 rsqrt per row

    # Scoped-VMEM budget: double-buffered in/out tiles + resident weights/params
    # + fp32 intermediates (z1/z2/head), 2x headroom; floor at 32 MiB so larger
    # tiles also compile on v5e's 16 MiB default, cap at v7x's 64 MiB physical.
    vmem_est = (2 * TB * Din * 4 + 2 * TB * NP * out_item + w_bytes
                + 4 * PR * PC + 4 * TB * (N1 + N2 + NP))
    vmem_limit = int(min(max(2 * vmem_est, 32 * 1024 * 1024), 64 * 1024 * 1024))

    out = pl.pallas_call(
        kernel,
        out_shape=jax.ShapeDtypeStruct((Bp, NP), out_dtype),
        grid=(Bp // TB,),
        in_specs=[
            pl.BlockSpec((TB, Din), lambda i: (i, 0)),           # activations: tiled on batch
            pl.BlockSpec((Din, N1), lambda i: (0, 0)),           # fused weights: VMEM-resident
            pl.BlockSpec((N1, N2), lambda i: (0, 0)),
            pl.BlockSpec((N2, NP), lambda i: (0, 0)),
            pl.BlockSpec((PR, PC), lambda i: (0, 0)),            # packed biases/LN/masks
        ],
        out_specs=pl.BlockSpec((TB, NP), lambda i: (i, 0)),      # lane-dense (128-wide) store
        compiler_params=pltpu.CompilerParams(
            dimension_semantics=("parallel",),
            vmem_limit_bytes=vmem_limit,
        ),
        cost_estimate=pl.CostEstimate(
            flops=flops,
            transcendentals=transcendentals,
            bytes_accessed=bytes_accessed,
        ),
    )(xcat, fp["w1b"], fp["w2b"], fp["wh"], fp["pk"])

    # TODO(synk): on v5e, consider out_dtype=bf16 and returning the padded (Bp, NP)
    # view so the consumer fuses this slice (halves the dominant HBM writeback).
    return out[:B, :n_actions]


def actor_forward_ref(state, cs, ratio, params):
    """Pure-JAX reference (unfused) for correctness checking."""
    def ln(x, g, b):
        m = jnp.mean(x, axis=-1, keepdims=True)
        v = jnp.mean((x - m) ** 2, axis=-1, keepdims=True)
        return (x - m) / jnp.sqrt(v + LN_EPS) * g + b

    h = jax.nn.relu(state @ params["w1"] + params["b1"])
    h = jax.nn.relu(h @ params["w2"] + params["b2"])
    c = jax.nn.relu(ln(cs @ params["wcs"] + params["bcs"], params["g1"], params["be1"]))
    c = jax.nn.relu(ln(c @ params["wcs2"] + params["bcs2"], params["g2"], params["be2"]))
    prob = h + c
    y = jax.nn.relu(ratio @ params["wr1"] + params["br1"])
    y = jax.nn.relu(y @ params["wr2"] + params["br2"])
    return jnp.tanh(prob @ params["wmu"] + params["bmu"] - y)


if __name__ == "__main__":
    B = 2
    input_dims = 16
    fc1_dims = 32
    fc2_dims = 32
    n_actions = 8

    key = jax.random.PRNGKey(0)
    k_state, k_cs, k_ratio, k_params = jax.random.split(key, 4)

    state = jax.random.normal(k_state, (B, input_dims), jnp.float32)
    cs = jax.random.normal(k_cs, (B, 7), jnp.float32)
    ratio = jax.random.uniform(k_ratio, (B, 1), jnp.float32)
    params = make_params(k_params, input_dims, fc1_dims, fc2_dims, n_actions)
    ref = actor_forward_ref(state, cs, ratio, params)

    # fp32-weight path: validates fusion / masked one-pass LayerNorm exactly (v5e parity).
    fused_f32 = fuse_params(params, input_dims, fc1_dims, fc2_dims, n_actions,
                            weight_dtype=jnp.float32)
    out_f32 = actor_forward(state, cs, ratio, fused_f32)
    jax.block_until_ready(out_f32)
    assert out_f32.shape == (B, n_actions)
    assert jnp.allclose(out_f32, ref, atol=2e-5, rtol=1e-5), "fp32 mismatch vs reference"

    # bf16-weight path (default; native MXU dtype on v6e/v7x): looser tolerance.
    fused_bf16 = fuse_params(params, input_dims, fc1_dims, fc2_dims, n_actions)
    out_bf16 = actor_forward(state, cs, ratio, fused_bf16)
    jax.block_until_ready(out_bf16)
    assert out_bf16.shape == (B, n_actions)
    assert jnp.allclose(out_bf16, ref, atol=6e-2, rtol=0.0), "bf16 mismatch vs reference"

    print("KERNEL_OK")
</pallas_src>

<mosaic_0001>
module attributes {stable_mosaic.version = 11 : i64} {
  func.func @actor_kernel(%arg0: i32, %arg1: memref<8x25xf32, #tpu.memory_space<vmem>>, %arg2: memref<25x128xf32, #tpu.memory_space<vmem>>, %arg3: memref<128x128xf32, #tpu.memory_space<vmem>>, %arg4: memref<128x128xf32, #tpu.memory_space<vmem>>, %arg5: memref<16x128xf32, #tpu.memory_space<vmem>>, %arg6: memref<8x128xf32, #tpu.memory_space<vmem>>) attributes {dimension_semantics = [#tpu.dimension_semantics<parallel>], iteration_bounds = array<i64: 1>, scalar_prefetch = 0 : i64, scratch_operands = 0 : i64, tpu.core_type = #tpu.core_type<tc>, window_params = [{transform_indices = @transform_0, window_bounds = array<i64: 8, 25>}, {pipeline_mode = #tpu.pipeline_mode<synchronous>, transform_indices = @transform_1, window_bounds = array<i64: 25, 128>}, {pipeline_mode = #tpu.pipeline_mode<synchronous>, transform_indices = @transform_2, window_bounds = array<i64: 128, 128>}, {pipeline_mode = #tpu.pipeline_mode<synchronous>, transform_indices = @transform_3, window_bounds = array<i64: 128, 128>}, {pipeline_mode = #tpu.pipeline_mode<synchronous>, transform_indices = @transform_4, window_bounds = array<i64: 16, 128>}, {transform_indices = @transform_5, window_bounds = array<i64: 8, 128>}]} {
    %c0 = arith.constant 0 : index
    %c0_0 = arith.constant 0 : index
    %0 = vector.load %arg5[%c0, %c0_0] : memref<16x128xf32, #tpu.memory_space<vmem>>, vector<16x128xf32>
    %c0_1 = arith.constant 0 : index
    %c0_2 = arith.constant 0 : index
    %1 = vector.load %arg1[%c0_1, %c0_2] : memref<8x25xf32, #tpu.memory_space<vmem>>, vector<8x25xf32>
    %c0_3 = arith.constant 0 : index
    %c0_4 = arith.constant 0 : index
    %2 = vector.load %arg2[%c0_3, %c0_4] : memref<25x128xf32, #tpu.memory_space<vmem>>, vector<25x128xf32>
    %cst = arith.constant dense<0.000000e+00> : vector<8x128xf32>
    %3 = tpu.matmul %1, %2, %cst {dimension_numbers = #tpu.dot_dimension_numbers<[1], [0], [0], [1], [0, 0, 1, 1], [], []>} : vector<8x25xf32>, vector<25x128xf32>, vector<8x128xf32> -> vector<8x128xf32>
    %4 = vector.extract_strided_slice %0 {offsets = [0, 0], sizes = [1, 128], strides = [1, 1]} : vector<16x128xf32> to vector<1x128xf32>
    %5 = vector.broadcast %4 : vector<1x128xf32> to vector<8x128xf32>
    %6 = arith.addf %3, %5 : vector<8x128xf32>
    %7 = vector.extract_strided_slice %0 {offsets = [7, 0], sizes = [1, 128], strides = [1, 1]} : vector<16x128xf32> to vector<1x128xf32>
    %8 = vector.extract_strided_slice %0 {offsets = [9, 0], sizes = [1, 128], strides = [1, 1]} : vector<16x128xf32> to vector<1x128xf32>
    %9 = vector.extract_strided_slice %0 {offsets = [2, 0], sizes = [1, 128], strides = [1, 1]} : vector<16x128xf32> to vector<1x128xf32>
    %10 = vector.extract_strided_slice %0 {offsets = [3, 0], sizes = [1, 128], strides = [1, 1]} : vector<16x128xf32> to vector<1x128xf32>
    %11 = vector.broadcast %7 : vector<1x128xf32> to vector<8x128xf32>
    %12 = arith.mulf %6, %11 : vector<8x128xf32>
    %cst_5 = arith.constant dense<0.000000e+00> : vector<8xf32>
    %13 = vector.multi_reduction <add>, %12, %cst_5 [1] : vector<8x128xf32> to vector<8xf32>
    %14 = vector.shape_cast %13 : vector<8xf32> to vector<8x1xf32>
    %cst_6 = arith.constant 3.125000e-02 : f32
    %15 = vector.broadcast %cst_6 : f32 to vector<8x1xf32>
    %16 = arith.mulf %14, %15 : vector<8x1xf32>
    %17 = arith.mulf %12, %12 : vector<8x128xf32>
    %cst_7 = arith.constant dense<0.000000e+00> : vector<8xf32>
    %18 = vector.multi_reduction <add>, %17, %cst_7 [1] : vector<8x128xf32> to vector<8xf32>
    %19 = vector.shape_cast %18 : vector<8xf32> to vector<8x1xf32>
    %cst_8 = arith.constant 3.125000e-02 : f32
    %20 = vector.broadcast %cst_8 : f32 to vector<8x1xf32>
    %21 = arith.mulf %19, %20 : vector<8x1xf32>
    %22 = arith.mulf %16, %16 : vector<8x1xf32>
    %23 = arith.subf %21, %22 : vector<8x1xf32>
    %cst_9 = arith.constant 0.000000e+00 : f32
    %24 = vector.broadcast %cst_9 : f32 to vector<8x1xf32>
    %25 = arith.maximumf %23, %24 : vector<8x1xf32>
    %26 = vector.broadcast %16 : vector<8x1xf32> to vector<8x128xf32>
    %27 = arith.subf %6, %26 : vector<8x128xf32>
    %cst_10 = arith.constant 9.99999974E-6 : f32
    %28 = vector.broadcast %cst_10 : f32 to vector<8x1xf32>
    %29 = arith.addf %25, %28 : vector<8x1xf32>
    %30 = math.rsqrt %29 : vector<8x1xf32>
    %31 = vector.broadcast %30 : vector<8x1xf32> to vector<8x128xf32>
    %32 = vector.broadcast %9 : vector<1x128xf32> to vector<8x128xf32>
    %33 = arith.mulf %31, %32 : vector<8x128xf32>
    %34 = arith.mulf %27, %33 : vector<8x128xf32>
    %35 = vector.broadcast %10 : vector<1x128xf32> to vector<8x128xf32>
    %36 = arith.addf %34, %35 : vector<8x128xf32>
    %37 = vector.broadcast %8 : vector<1x128xf32> to vector<8x128xf32>
    %38 = arith.mulf %37, %6 : vector<8x128xf32>
    %39 = arith.addf %36, %38 : vector<8x128xf32>
    %cst_11 = arith.constant 0.000000e+00 : f32
    %40 = vector.broadcast %cst_11 : f32 to vector<8x128xf32>
    %41 = arith.maximumf %39, %40 : vector<8x128xf32>
    %c0_12 = arith.constant 0 : index
    %c0_13 = arith.constant 0 : index
    %42 = vector.load %arg3[%c0_12, %c0_13] : memref<128x128xf32, #tpu.memory_space<vmem>>, vector<128x128xf32>
    %cst_14 = arith.constant dense<0.000000e+00> : vector<8x128xf32>
    %43 = tpu.matmul %41, %42, %cst_14 {dimension_numbers = #tpu.dot_dimension_numbers<[1], [0], [0], [1], [0, 0, 1, 1], [], []>} : vector<8x128xf32>, vector<128x128xf32>, vector<8x128xf32> -> vector<8x128xf32>
    %44 = vector.extract_strided_slice %0 {offsets = [1, 0], sizes = [1, 128], strides = [1, 1]} : vector<16x128xf32> to vector<1x128xf32>
    %45 = vector.broadcast %44 : vector<1x128xf32> to vector<8x128xf32>
    %46 = arith.addf %43, %45 : vector<8x128xf32>
    %47 = vector.extract_strided_slice %0 {offsets = [8, 0], sizes = [1, 128], strides = [1, 1]} : vector<16x128xf32> to vector<1x128xf32>
    %48 = vector.extract_strided_slice %0 {offsets = [10, 0], sizes = [1, 128], strides = [1, 1]} : vector<16x128xf32> to vector<1x128xf32>
    %49 = vector.extract_strided_slice %0 {offsets = [4, 0], sizes = [1, 128], strides = [1, 1]} : vector<16x128xf32> to vector<1x128xf32>
    %50 = vector.extract_strided_slice %0 {offsets = [5, 0], sizes = [1, 128], strides = [1, 1]} : vector<16x128xf32> to vector<1x128xf32>
    %51 = vector.broadcast %47 : vector<1x128xf32> to vector<8x128xf32>
    %52 = arith.mulf %46, %51 : vector<8x128xf32>
    %cst_15 = arith.constant dense<0.000000e+00> : vector<8xf32>
    %53 = vector.multi_reduction <add>, %52, %cst_15 [1] : vector<8x128xf32> to vector<8xf32>
    %54 = vector.shape_cast %53 : vector<8xf32> to vector<8x1xf32>
    %cst_16 = arith.constant 3.125000e-02 : f32
    %55 = vector.broadcast %cst_16 : f32 to vector<8x1xf32>
    %56 = arith.mulf %54, %55 : vector<8x1xf32>
    %57 = arith.mulf %52, %52 : vector<8x128xf32>
    %cst_17 = arith.constant dense<0.000000e+00> : vector<8xf32>
    %58 = vector.multi_reduction <add>, %57, %cst_17 [1] : vector<8x128xf32> to vector<8xf32>
    %59 = vector.shape_cast %58 : vector<8xf32> to vector<8x1xf32>
    %cst_18 = arith.constant 3.125000e-02 : f32
    %60 = vector.broadcast %cst_18 : f32 to vector<8x1xf32>
    %61 = arith.mulf %59, %60 : vector<8x1xf32>
    %62 = arith.mulf %56, %56 : vector<8x1xf32>
    %63 = arith.subf %61, %62 : vector<8x1xf32>
    %cst_19 = arith.constant 0.000000e+00 : f32
    %64 = vector.broadcast %cst_19 : f32 to vector<8x1xf32>
    %65 = arith.maximumf %63, %64 : vector<8x1xf32>
    %66 = vector.broadcast %56 : vector<8x1xf32> to vector<8x128xf32>
    %67 = arith.subf %46, %66 : vector<8x128xf32>
    %cst_20 = arith.constant 9.99999974E-6 : f32
    %68 = vector.broadcast %cst_20 : f32 to vector<8x1xf32>
    %69 = arith.addf %65, %68 : vector<8x1xf32>
    %70 = math.rsqrt %69 : vector<8x1xf32>
    %71 = vector.broadcast %70 : vector<8x1xf32> to vector<8x128xf32>
    %72 = vector.broadcast %49 : vector<1x128xf32> to vector<8x128xf32>
    %73 = arith.mulf %71, %72 : vector<8x128xf32>
    %74 = arith.mulf %67, %73 : vector<8x128xf32>
    %75 = vector.broadcast %50 : vector<1x128xf32> to vector<8x128xf32>
    %76 = arith.addf %74, %75 : vector<8x128xf32>
    %77 = vector.broadcast %48 : vector<1x128xf32> to vector<8x128xf32>
    %78 = arith.mulf %77, %46 : vector<8x128xf32>
    %79 = arith.addf %76, %78 : vector<8x128xf32>
    %cst_21 = arith.constant 0.000000e+00 : f32
    %80 = vector.broadcast %cst_21 : f32 to vector<8x128xf32>
    %81 = arith.maximumf %79, %80 : vector<8x128xf32>
    %c0_22 = arith.constant 0 : index
    %c0_23 = arith.constant 0 : index
    %82 = vector.load %arg4[%c0_22, %c0_23] : memref<128x128xf32, #tpu.memory_space<vmem>>, vector<128x128xf32>
    %cst_24 = arith.constant dense<0.000000e+00> : vector<8x128xf32>
    %83 = tpu.matmul %81, %82, %cst_24 {dimension_numbers = #tpu.dot_dimension_numbers<[1], [0], [0], [1], [0, 0, 1, 1], [], []>} : vector<8x128xf32>, vector<128x128xf32>, vector<8x128xf32> -> vector<8x128xf32>
    %84 = vector.extract_strided_slice %0 {offsets = [6, 0], sizes = [1, 128], strides = [1, 1]} : vector<16x128xf32> to vector<1x128xf32>
    %85 = vector.broadcast %84 : vector<1x128xf32> to vector<8x128xf32>
    %86 = arith.addf %83, %85 : vector<8x128xf32>
    %87 = math.tanh %86 : vector<8x128xf32>
    %c0_25 = arith.constant 0 : index
    %c0_26 = arith.constant 0 : index
    %88 = vector.load %arg6[%c0_25, %c0_26] : memref<8x128xf32, #tpu.memory_space<vmem>>, vector<8x128xf32>
    tpu.vector_store %arg6[%c0_25, %c0_26], %87 {strides = array<i32>} : memref<8x128xf32, #tpu.memory_space<vmem>>, vector<8x128xf32>,
    return
  }
  func.func @transform_0(%arg0: i32) -> (i32, i32) {
    %c0_i32 = arith.constant 0 : i32
    %c0_i32_0 = arith.constant 0 : i32
    return %arg0, %c0_i32 : i32, i32
  }
  func.func @transform_1(%arg0: i32) -> (i32, i32) {
    %c0_i32 = arith.constant 0 : i32
    %c0_i32_0 = arith.constant 0 : i32
    %c0_i32_1 = arith.constant 0 : i32
    return %c0_i32, %c0_i32_0 : i32, i32
  }
  func.func @transform_2(%arg0: i32) -> (i32, i32) {
    %c0_i32 = arith.constant 0 : i32
    %c0_i32_0 = arith.constant 0 : i32
    %c0_i32_1 = arith.constant 0 : i32
    return %c0_i32, %c0_i32_0 : i32, i32
  }
  func.func @transform_3(%arg0: i32) -> (i32, i32) {
    %c0_i32 = arith.constant 0 : i32
    %c0_i32_0 = arith.constant 0 : i32
    %c0_i32_1 = arith.constant 0 : i32
    return %c0_i32, %c0_i32_0 : i32, i32
  }
  func.func @transform_4(%arg0: i32) -> (i32, i32) {
    %c0_i32 = arith.constant 0 : i32
    %c0_i32_0 = arith.constant 0 : i32
    %c0_i32_1 = arith.constant 0 : i32
    return %c0_i32, %c0_i32_0 : i32, i32
  }
  func.func @transform_5(%arg0: i32) -> (i32, i32) {
    %c0_i32 = arith.constant 0 : i32
    %c0_i32_0 = arith.constant 0 : i32
    return %arg0, %c0_i32 : i32, i32
  }
}

</mosaic_0001>

<bundles_post_ra>
// kernel: tpu_custom_call.1
= control target key start
LH: loop header
LB: loop body
LE: loop exit
PB: predicated region body
PF: predicated region fallthrough
CT: control target
= control target key end

     0   :  { %10 = vsyncpa [#allocation3], 0  ;;  %s543_s0 = inlined_call_operand.hbm [shape: f32[8,25], index: 0, kind: input, shape index: {}]   ;;  %s544_s1 = inlined_call_operand.hbm [shape: f32[25,128], index: 1, kind: input, shape index: {}]   ;;  %s545_s2 = inlined_call_operand.hbm [shape: f32[128,128], index: 2, kind: input, shape index: {}]   ;;  %s546_s3 = inlined_call_operand.hbm [shape: f32[128,128], index: 3, kind: input, shape index: {}]   ;;  %s547_s4 = inlined_call_operand.hbm [shape: f32[16,128], index: 4, kind: input, shape index: {}]   ;;  %s548_s5 = inlined_call_operand.hbm [shape: f32[8,128], index: 5, kind: output, shape index: {}]  }
   0x1   :  { %11 = vsyncpa [#allocation6], 0 }
   0x2   :  { %12 = vsyncpa [#allocation9], 0  ;;  %s29_s20 = sshll.u32 %s544_s1, 4  ;;  %s30_s20 = int_to_ptr.hbm [resolvable:$true] %s29_s20 }
   0x3   :  { %13 = vsyncpa [#allocation4], 0  ;;  %s462_s21 = smov [#allocation5]   ;;  %s55_s25 = sshll.u32 %s546_s3, 4  ;;  %s56_s25 = int_to_ptr.hbm [resolvable:$true] %s55_s25 }
   0x4   :  { %s31_s22 = sshll.u32 %s462_s21, 4  ;;  %s463_s26 = smov 128   ;;  %s32_s22 = int_to_ptr.vmem [resolvable:$true] %s31_s22 }
   0x5   :  { %s464_s27 = smov 8   ;;  %s465_s28 = smov [#allocation8]  }
   0x6   :  { %37 = dma.hbm_to_vmem [thread:$0]  %s30_s20, 512, %s32_s22, [#allocation6], %s463_s26, %s463_s26, %s464_s27  }
   0x7   :  { %s57_s29 = sshll.u32 %s465_s28, 4  ;;  %s19_s7 = sshll.u32 %s543_s0, 4  ;;  %s58_s29 = int_to_ptr.vmem [resolvable:$true] %s57_s29  ;;  %s20_s7 = int_to_ptr.hbm [resolvable:$true] %s19_s7 }
   0x8   :  { %63 = dma.hbm_to_vmem [thread:$0]  %s56_s25, 2048, %s58_s29, [#allocation9], %s463_s26, %s463_s26, %s464_s27  }
   0x9   :  { %s42_s9 = sshll.u32 %s545_s2, 4  ;;  %s466_s10 = smov [#allocation2]   ;;  %s43_s9 = int_to_ptr.hbm [resolvable:$true] %s42_s9 }
   0xa   :  { %s21_s11 = sshll.u32 %s466_s10, 4  ;;  %s467_s3 = smov [#allocation7]   ;;  %s22_s11 = int_to_ptr.vmem [resolvable:$true] %s21_s11 }
   0xb   :  { %24 = dma.hbm_to_vmem [thread:$0]  %s20_s7, 128, %s22_s11, [#allocation3]  }
   0xc   :  { %s44_s12 = sshll.u32 %s467_s3, 4  ;;  %s68_s15 = sshll.u32 %s547_s4, 4  ;;  %s45_s12 = int_to_ptr.vmem [resolvable:$true] %s44_s12  ;;  %s69_s15 = int_to_ptr.hbm [resolvable:$true] %s68_s15 }
   0xd   :  { %50 = dma.hbm_to_vmem [thread:$0]  %s43_s9, 2048, %s45_s12, [#allocation6], %s463_s26, %s463_s26, %s464_s27  }
   0xe   :  { %s468_s0 = smov [#allocation10]  }
   0xf   :  { %s70_s16 = sshll.u32 %s468_s0, 4  ;;  %s71_s16 = int_to_ptr.vmem [resolvable:$true] %s70_s16 }
  0x10   :  { %76 = dma.hbm_to_vmem [thread:$0]  %s69_s15, 256, %s71_s16, [#allocation9], %s463_s26, %s463_s26, %s464_s27  }
  0x11   :  { %454 = dma.done.wait [#allocation3], 128  }
  0x12   :  { %455 = vsyncadd [#allocation3], 4294967168 }
  0x13   :  { %456 = dma.done.wait [#allocation6], 2560  }
  0x14   :  { %457 = vsyncadd [#allocation6], 4294964736 }
  0x15   :  { %458 = dma.done.wait [#allocation9], 2304  }
  0x16   :  { %459 = vsyncadd [#allocation9], 4294964992  ;;  %vm109_vm0 = vcmask 1040384   ;;  %v103_v0 = vld [vmem:[#allocation5 + $0x18] sm:$0x1]  ;;  %v102_v1 = vld [vmem:[#allocation5 + $0x10] sm:$0xff] }
  0x17   :  { %294 = vmatpush.msk.msra.mxu0 %vm109_vm0, %v103_v0  ;;  %v101_v2 = vld [vmem:[#allocation5 + $0x8] sm:$0xff]  ;;  %v100_v3 = vld [vmem:[#allocation5] sm:$0xff]  ;;  %v99_v4 = vld [vmem:[#allocation2] sm:$0xff]  ;;  %vm105_vm1 = vcmask 203776   ;;  %s469_s2 = smov [#allocation11]   ;;  %s282_s19 = sshll.u32 %s548_s5, 4  ;;  %s283_s19 = int_to_ptr.hbm [resolvable:$true] %s282_s19 }
  0x18   :  { %v515_v5 = vld [vmem:[#allocation10] sm:$0xff]  ;;  %v181_v12 = vld [vmem:[#allocation7 + $0x78] sm:$0xff]  ;;  %v180_v13 = vld [vmem:[#allocation7 + $0x70] sm:$0xff]  ;;  %s280_s4 = sshll.u32 %s469_s2, 4  ;;  %s281_s4 = int_to_ptr.vmem [resolvable:$true] %s280_s4 }
  0x19   :  { %126 = vmatpush.msra.mxu0 %v102_v1  ;;  %v104_v6 = vperm.slane %v515_v5, 0  ;;  %v133_v7 = vperm.slane %v515_v5, 7  ;;  %183 = vmatpush.msra.mxu1 %v181_v12  ;;  %v179_v14 = vld [vmem:[#allocation7 + $0x68] sm:$0xff]  ;;  %v178_v15 = vld [vmem:[#allocation7 + $0x60] sm:$0xff]  ;;  %v177_v16 = vld [vmem:[#allocation7 + $0x58] sm:$0xff]  ;;  %v157_v41 = vperm.slane %v515_v5, 2 }
  0x1a   :  { %v176_v17 = vld [vmem:[#allocation7 + $0x50] sm:$0xff]  ;;  %v175_v18 = vld [vmem:[#allocation7 + $0x48] sm:$0xff]  ;;  %v174_v19 = vld [vmem:[#allocation7 + $0x40] sm:$0xff]  ;;  %v160_v47 = vperm.slane %v515_v5, 3  ;;  %v182_v54 = vperm.slane %v515_v5, 1 }
  0x1b   :  { %127 = vmatpush.msra.mxu0 %v101_v2  ;;  %184 = vmatpush.msra.mxu1 %v180_v13  ;;  %v173_v20 = vld [vmem:[#allocation7 + $0x38] sm:$0xff]  ;;  %v172_v21 = vld [vmem:[#allocation7 + $0x30] sm:$0xff]  ;;  %v171_v23 = vld [vmem:[#allocation7 + $0x28] sm:$0xff] }
  0x1c   :  { %v170_v24 = vld [vmem:[#allocation7 + $0x20] sm:$0xff]  ;;  %v169_v25 = vld [vmem:[#allocation7 + $0x18] sm:$0xff]  ;;  %v168_v27 = vld [vmem:[#allocation7 + $0x10] sm:$0xff] }
  0x1d   :  { %128 = vmatpush.msra.mxu0 %v100_v3  ;;  %185 = vmatpush.msra.mxu1 %v179_v14  ;;  %v167_v28 = vld [vmem:[#allocation7 + $0x8] sm:$0xff]  ;;  %v166_v32 = vld [vmem:[#allocation7] sm:$0xff]  ;;  %v251_v60 = vld [vmem:[#allocation8 + $0x78] sm:$0xff] }
  0x1e   :  { %295 = vmatmul.msk.f32.vlgmr.msra.gmra.mxu0 %vm105_vm1, %v99_v4  ;;  %v523_v43 = vld [vmem:[#allocation10 + $0x8] sm:$0xff]  ;;  %253 = vmatpush.msra.mxu2 %v251_v60  ;;  %v250_v61 = vld [vmem:[#allocation8 + $0x70] sm:$0xff]  ;;  %v248_v63 = vld [vmem:[#allocation8 + $0x60] sm:$0xff] }
  0x1f   :  { %186 = vmatpush.msra.mxu1 %v178_v15  ;;  %v162_v48 = vperm.slane %v523_v43, 1  ;;  %v203_v55 = vperm.slane %v523_v43, 0  ;;  %v249_v62 = vld [vmem:[#allocation8 + $0x68] sm:$0xff]  ;;  %v247_v0 = vld [vmem:[#allocation8 + $0x58] sm:$0xff]  ;;  %v246_v1 = vld [vmem:[#allocation8 + $0x50] sm:$0xff] }
  0x20   :  { %254 = vmatpush.msra.mxu2 %v250_v61  ;;  %v245_v2 = vld [vmem:[#allocation8 + $0x48] sm:$0xff]  ;;  %v244_v3 = vld [vmem:[#allocation8 + $0x40] sm:$0xff]  ;;  %v243_v4 = vld [vmem:[#allocation8 + $0x38] sm:$0xff] }
  0x21   :  { %187 = vmatpush.msra.mxu1 %v177_v16  ;;  %v238_v12 = vld [vmem:[#allocation8 + $0x10] sm:$0xff]  ;;  %v237_v13 = vld [vmem:[#allocation8 + $0x8] sm:$0xff] }
  0x22   :  { %255 = vmatpush.msra.mxu2 %v249_v62 }
  0x23   :  { %188 = vmatpush.msra.mxu1 %v176_v17  ;;  %v236_v17 = vld [vmem:[#allocation8] sm:$0xff] }
  0x24   :  { %256 = vmatpush.msra.mxu2 %v248_v63 }
  0x25   :  { %189 = vmatpush.msra.mxu1 %v175_v18 }
  0x26   :  { %257 = vmatpush.msra.mxu2 %v247_v0 }
  0x27   :  { %190 = vmatpush.msra.mxu1 %v174_v19 }
  0x28   :  { %258 = vmatpush.msra.mxu2 %v246_v1 }
  0x29   :  { %191 = vmatpush.msra.mxu1 %v173_v20 }
  0x2a   :  { %259 = vmatpush.msra.mxu2 %v245_v2 }
  0x2b   :  { %192 = vmatpush.msra.mxu1 %v172_v21 }
  0x2c   :  { %260 = vmatpush.msra.mxu2 %v244_v3 }
  0x2d   :  { %193 = vmatpush.msra.mxu1 %v171_v23 }
  0x2e   :  { %261 = vmatpush.msra.mxu2 %v243_v4 }
  0x2f   :  { %194 = vmatpush.msra.mxu1 %v170_v24 }
  0x31   :  { %195 = vmatpush.msra.mxu1 %v169_v25 }
  0x33   :  { %196 = vmatpush.msra.mxu1 %v168_v27 }
  0x35   :  { %197 = vmatpush.msra.mxu1 %v167_v28 }
  0x37   :  { %198 = vmatpush.msra.mxu1 %v166_v32  ;;  %v232_v32 = vperm.slane %v523_v43, 2 }
  0x9b   :  { %v130_v8 = vpop.f32.mrf.mxu0 }
  0x9c   :  { %v519_v9 = vadd.f32 %v130_v8, %v104_v6  ;;  %v242_v6 = vld [vmem:[#allocation8 + $0x30] sm:$0xff]  ;;  %v241_v8 = vld [vmem:[#allocation8 + $0x28] sm:$0xff] }
  0x9d   :  { %262 = vmatpush.msra.mxu2 %v242_v6 }
  0x9e   :  { %v134_v10 = vmul.f32 %v133_v7, %v519_v9  ;;  %v163_v51 = vmul.f32 %v162_v48, %v519_v9 }
  0x9f   :  { %263 = vmatpush.msra.mxu2 %v241_v8 }
  0xa0   :  { %135 = vadd.xlane.f32.xlu0 %v134_v10  ;;  %v138_v11 = vmul.f32 %v134_v10, %v134_v10  ;;  %v239_v10 = vld [vmem:[#allocation8 + $0x18] sm:$0xff] }
  0xa8   :  { %139 = vadd.xlane.f32.xlu0 %v138_v11 }
 0x113   :  { %v136_v22 = vpop.xlane.xlu0 %135 }
 0x114   :  { %v137_v26 = vmul.f32 0.03125, %v136_v22 }
 0x116   :  { %v142_v30 = vmul.f32 %v137_v26, %v137_v26  ;;  %v145_v45 = vsub.f32 %v519_v9, %v137_v26  ;;  %v240_v9 = vld [vmem:[#allocation8 + $0x20] sm:$0xff]  ;;  %v227_v26 = vperm.slane %v515_v5, 4 }
 0x117   :  { %264 = vmatpush.msra.mxu2 %v240_v9 }
 0x119   :  { %265 = vmatpush.msra.mxu2 %v239_v10 }
 0x11b   :  { %v140_v29 = vpop.xlane.xlu0 %139  ;;  %266 = vmatpush.msra.mxu2 %v238_v12 }
 0x11c   :  { %v141_v31 = vmul.f32 0.03125, %v140_v29 }
 0x11d   :  { %267 = vmatpush.msra.mxu2 %v237_v13 }
 0x11e   :  { %v143_v33 = vsub.f32 %v141_v31, %v142_v30  ;;  %v230_v31 = vperm.slane %v515_v5, 5 }
 0x11f   :  { %268 = vmatpush.msra.mxu2 %v236_v17 }
 0x120   :  { %v144_v34 = vmax.f32 %v143_v33, 0.0 }
 0x122   :  { %v146_v35 = vadd.f32 1e-05, %v144_v34 }
 0x124   :  { %304 = vrsqrt.f32 %v146_v35  ;;  %vm153_vm3 = vweird.f32 %v146_v35 }
 0x12a   :  { %v305_v36 = vpop.eup %304 }
 0x12b   :  { %v148_v37 = vmul.f32 %v305_v36, %v146_v35  ;;  %vm154_vm2 = vweird.f32 %v305_v36 }
 0x12c   :  { %vm155_vm4 = vmor %vm153_vm3, %vm154_vm2 }
 0x12d   :  { %v149_v38 = vmul.f32 %v305_v36, %v148_v37 }
 0x12f   :  { %v150_v39 = vmul.f32 0.5, %v149_v38  ;;  %v252_v38 = vperm.slane %v515_v5, 6 }
 0x131   :  { %v151_v40 = vsub.f32 1.5, %v150_v39 }
 0x133   :  { %v152_v42 = vmul.f32 %v305_v36, %v151_v40 }
 0x135   :  { %v156_v44 = vsel %vm155_vm4, %v305_v36, %v152_v42 }
 0x136   :  { %v158_v46 = vmul.f32 %v157_v41, %v156_v44 }
 0x138   :  { %v159_v49 = vmul.f32 %v158_v46, %v145_v45 }
 0x13a   :  { %v161_v50 = vadd.f32 %v160_v47, %v159_v49 }
 0x13c   :  { %v164_v52 = vadd.f32 %v163_v51, %v161_v50 }
 0x13e   :  { %v165_v53 = vmax.f32 %v164_v52, 0.0 }
 0x140   :  { %199 = vmatmul.f32.vlgmr.msra.gmra.mxu1 %v165_v53 }
 0x1bd   :  { %v200_v56 = vpop.f32.mrf.mxu1 }
 0x1be   :  { %v531_v57 = vadd.f32 %v200_v56, %v182_v54 }
 0x1c0   :  { %v204_v58 = vmul.f32 %v203_v55, %v531_v57  ;;  %v233_v35 = vmul.f32 %v232_v32, %v531_v57 }
 0x1c2   :  { %205 = vadd.xlane.f32.xlu1 %v204_v58  ;;  %v208_v59 = vmul.f32 %v204_v58, %v204_v58 }
 0x1ca   :  { %209 = vadd.xlane.f32.xlu1 %v208_v59 }
 0x235   :  { %v206_v7 = vpop.xlane.xlu1 %205 }
 0x236   :  { %v207_v11 = vmul.f32 0.03125, %v206_v7 }
 0x238   :  { %v212_v15 = vmul.f32 %v207_v11, %v207_v11  ;;  %v215_v29 = vsub.f32 %v531_v57, %v207_v11 }
 0x23d   :  { %v210_v14 = vpop.xlane.xlu1 %209 }
 0x23e   :  { %v211_v16 = vmul.f32 0.03125, %v210_v14 }
 0x240   :  { %v213_v18 = vsub.f32 %v211_v16, %v212_v15 }
 0x242   :  { %v214_v19 = vmax.f32 %v213_v18, 0.0 }
 0x244   :  { %v216_v20 = vadd.f32 1e-05, %v214_v19 }
 0x246   :  { %306 = vrsqrt.f32 %v216_v20  ;;  %vm223_vm6 = vweird.f32 %v216_v20 }
 0x24c   :  { %v307_v21 = vpop.eup %306 }
 0x24d   :  { %v218_v22 = vmul.f32 %v307_v21, %v216_v20  ;;  %vm224_vm5 = vweird.f32 %v307_v21 }
 0x24e   :  { %vm225_vm7 = vmor %vm223_vm6, %vm224_vm5 }
 0x24f   :  { %v219_v23 = vmul.f32 %v307_v21, %v218_v22 }
 0x251   :  { %v220_v24 = vmul.f32 0.5, %v219_v23 }
 0x253   :  { %v221_v25 = vsub.f32 1.5, %v220_v24 }
 0x255   :  { %v222_v27 = vmul.f32 %v307_v21, %v221_v25 }
 0x257   :  { %v226_v28 = vsel %vm225_vm7, %v307_v21, %v222_v27 }
 0x258   :  { %v228_v30 = vmul.f32 %v227_v26, %v226_v28 }
 0x25a   :  { %v229_v33 = vmul.f32 %v228_v30, %v215_v29 }
 0x25c   :  { %v231_v34 = vadd.f32 %v230_v31, %v229_v33 }
 0x25e   :  { %v234_v36 = vadd.f32 %v233_v35, %v231_v34 }
 0x260   :  { %v235_v37 = vmax.f32 %v234_v36, 0.0 }
 0x262   :  { %269 = vmatmul.f32.vlgmr.msra.gmra.mxu2 %v235_v37 }
 0x2e5   :  { %v270_v39 = vpop.f32.mrf.mxu2 }
 0x2e6   :  { %v271_v40 = vadd.f32 %v270_v39, %v252_v38 }
 0x2e8   :  { %308 = vtanh.f32 %v271_v40 }
 0x2ee   :  { %v309_v41 = vpop.eup %308 }
 0x2ef   :  { %274 = vst [vmem:[#allocation11] sm:$0xff] %v309_v41 }
 0x2f0   :  { %285 = dma.vmem_to_hbm [thread:$0]  %s281_s4, 128, %s283_s19, [#allocation4]  }
 0x2f1   :  { %460 = dma.done.wait [#allocation4], 128  }
 0x2f2   :  { %461 = vsyncadd [#allocation4], 4294967168 }
 0x2f3   :  { %290 = vsyncpa [#allocation3], 1 }
 0x2f4   :  { %291 = vsyncpa [#allocation6], 1 }
 0x2f5   :  { %292 = vsyncpa [#allocation9], 1 }
 0x2f6   :  { %293 = vsyncpa [#allocation4], 1 }

</bundles_post_ra>
